<compile_context>
chip_gen: v6e
topology: v6e:2x2x1
jax: 0.10.0
libtpu: 0.0.40
codegen_flags: <defaults>
</compile_context>

<pallas_src>
import math

import jax
import jax.numpy as jnp
from jax.experimental import pallas as pl
from jax.experimental.pallas import tpu as pltpu


_GELU_C = math.sqrt(2.0 / math.pi)
_GELU_C2 = 0.044715 * _GELU_C


def _round_up(x, m):
    return ((x + m - 1) // m) * m


def ffn_kernel(x_ref, w1_ref, b1_ref, w2_ref, b2_ref, o_ref):
    """Fused FFN tile: (x @ W1 + b1) -> tanh-GELU -> (@ W2 + b2)."""
    # First linear: MXU matmul in the compute dtype with f32 accumulation.
    h = jnp.dot(x_ref[...], w1_ref[...], preferred_element_type=jnp.float32)
    h = h + b1_ref[...]  # (1, H) bias broadcast in f32

    # tanh-GELU (PyTorch-exact form), computed in f32.
    # 0.5*h*(1 + tanh(c*h + c*0.044715*h^3)) with the polynomial refactored to
    # h*(c + c2*h*h): 3 muls + 1 add feeding the EUP tanh.
    c = jnp.float32(_GELU_C)
    c2 = jnp.float32(_GELU_C2)
    t = jnp.tanh(h * (c + c2 * (h * h)))
    g = 0.5 * h * (1.0 + t)

    # Second linear back to emb_dim; operands in compute dtype, f32 accumulate.
    y = jnp.dot(g.astype(w2_ref.dtype), w2_ref[...],
                preferred_element_type=jnp.float32)
    y = y + b2_ref[...]
    o_ref[...] = y.astype(o_ref.dtype)


def feed_forward(x, w1, b1, w2, b2, *, block_m=512, compute_dtype=jnp.bfloat16):
    """x: (B, S, E) -> (B, S, E).  Weights stored (in_features, out_features)."""
    B, S, E = x.shape
    H = w1.shape[1]
    assert w1.shape == (E, H) and w2.shape == (H, E)
    assert b1.shape == (1, H) and b2.shape == (1, E)

    out_dtype = x.dtype
    M = B * S

    # Lane-align E and H to 128; tile the token dim (sublane-aligned to 8).
    E_pad = _round_up(E, 128)
    H_pad = _round_up(H, 128)
    tm = min(block_m, _round_up(M, 8))
    M_pad = _round_up(M, tm)

    x2d = jnp.pad(x.reshape(M, E).astype(compute_dtype),
                  ((0, M_pad - M), (0, E_pad - E)))
    w1p = jnp.pad(w1.astype(compute_dtype), ((0, E_pad - E), (0, H_pad - H)))
    w2p = jnp.pad(w2.astype(compute_dtype), ((0, H_pad - H), (0, E_pad - E)))
    b1p = jnp.pad(b1.astype(jnp.float32), ((0, 0), (0, H_pad - H)))
    b2p = jnp.pad(b2.astype(jnp.float32), ((0, 0), (0, E_pad - E)))

    # VMEM budget: resident weights + double-buffered x/out tiles + f32 temps.
    cbytes = jnp.dtype(compute_dtype).itemsize
    obytes = jnp.dtype(out_dtype).itemsize
    est = 2 * (E_pad * H_pad + H_pad * E_pad) * cbytes   # weights
    est += 2 * (H_pad + E_pad) * 4                       # biases
    est += 2 * tm * E_pad * (cbytes + obytes)            # pipelined x / out tiles
    est += 2 * tm * H_pad * 4                            # f32 h / g temporaries
    vmem_limit = int(min(max(int(est * 1.5) + (4 << 20), 32 << 20), 64 << 20))

    # TODO(synk): for very large emb/hidden dims where resident weights exceed
    # VMEM (esp. v7x's 64 MiB), add an H-reduction grid axis (marked
    # "arbitrary", placed last) with an f32 accumulator scratch and pl.when
    # init/finalize instead of keeping both weights resident.

    out2d = pl.pallas_call(
        ffn_kernel,
        out_shape=jax.ShapeDtypeStruct((M_pad, E_pad), out_dtype),
        grid_spec=pltpu.PrefetchScalarGridSpec(
            num_scalar_prefetch=0,
            grid=(M_pad // tm,),
            in_specs=[
                pl.BlockSpec((tm, E_pad), lambda i: (i, 0)),     # x tile (pipelined)
                pl.BlockSpec((E_pad, H_pad), lambda i: (0, 0)),  # w1 (resident)
                pl.BlockSpec((1, H_pad), lambda i: (0, 0)),      # b1 (resident)
                pl.BlockSpec((H_pad, E_pad), lambda i: (0, 0)),  # w2 (resident)
                pl.BlockSpec((1, E_pad), lambda i: (0, 0)),      # b2 (resident)
            ],
            out_specs=pl.BlockSpec((tm, E_pad), lambda i: (i, 0)),
        ),
        compiler_params=pltpu.CompilerParams(
            dimension_semantics=("parallel",),
            vmem_limit_bytes=vmem_limit,
        ),
    )(x2d, w1p, b1p, w2p, b2p)

    return out2d[:M, :E].reshape(B, S, E)


def reference_ffn(x, w1, b1, w2, b2):
    """Pure-JAX reference mirroring the PyTorch forward (all f32)."""
    h = x @ w1 + b1[0]
    g = 0.5 * h * (1.0 + jnp.tanh(jnp.sqrt(2.0 / jnp.pi) * (h + 0.044715 * h ** 3)))
    return g @ w2 + b2[0]


if __name__ == "__main__":
    # Small config consistent with the module: emb_dim=32 -> hidden=4*32=128.
    batch, seq, emb_dim = 2, 8, 32
    hidden = 4 * emb_dim

    key = jax.random.PRNGKey(0)
    kx, k1, k2, k3, k4 = jax.random.split(key, 5)

    x = jax.random.normal(kx, (batch, seq, emb_dim), dtype=jnp.float32)
    w1 = jax.random.normal(k1, (emb_dim, hidden), dtype=jnp.float32) / jnp.sqrt(emb_dim)
    b1 = jax.random.normal(k2, (1, hidden), dtype=jnp.float32) * 0.01
    w2 = jax.random.normal(k3, (hidden, emb_dim), dtype=jnp.float32) / jnp.sqrt(hidden)
    b2 = jax.random.normal(k4, (1, emb_dim), dtype=jnp.float32) * 0.01

    ref = reference_ffn(x, w1, b1, w2, b2)

    # f32-operand path: tight check against the PyTorch-equivalent reference.
    out_f32 = jax.block_until_ready(
        feed_forward(x, w1, b1, w2, b2, compute_dtype=jnp.float32))
    assert out_f32.shape == (batch, seq, emb_dim)
    assert jnp.allclose(out_f32, ref, atol=1e-4, rtol=1e-4), "f32 mismatch vs reference"

    # bf16-operand fast path (v6e/v7x MXU peak); f32 accumulation, looser tol.
    out_bf16 = jax.block_until_ready(
        feed_forward(x, w1, b1, w2, b2, compute_dtype=jnp.bfloat16))
    assert out_bf16.shape == (batch, seq, emb_dim)
    assert jnp.allclose(out_bf16, ref, atol=1e-1, rtol=1e-1), "bf16 mismatch vs reference"

    print("KERNEL_OK")
</pallas_src>

<mosaic_0001>
module attributes {stable_mosaic.version = 11 : i64} {
  func.func @ffn_kernel(%arg0: i32, %arg1: memref<16x128xf32, #tpu.memory_space<vmem>>, %arg2: memref<128x128xf32, #tpu.memory_space<vmem>>, %arg3: memref<1x128xf32, #tpu.memory_space<vmem>>, %arg4: memref<128x128xf32, #tpu.memory_space<vmem>>, %arg5: memref<1x128xf32, #tpu.memory_space<vmem>>, %arg6: memref<16x128xf32, #tpu.memory_space<vmem>>) attributes {dimension_semantics = [#tpu.dimension_semantics<parallel>], iteration_bounds = array<i64: 1>, scalar_prefetch = 0 : i64, scratch_operands = 0 : i64, tpu.core_type = #tpu.core_type<tc>, window_params = [{transform_indices = @transform_0, window_bounds = array<i64: 16, 128>}, {pipeline_mode = #tpu.pipeline_mode<synchronous>, transform_indices = @transform_1, window_bounds = array<i64: 128, 128>}, {pipeline_mode = #tpu.pipeline_mode<synchronous>, transform_indices = @transform_2, window_bounds = array<i64: 1, 128>}, {pipeline_mode = #tpu.pipeline_mode<synchronous>, transform_indices = @transform_3, window_bounds = array<i64: 128, 128>}, {pipeline_mode = #tpu.pipeline_mode<synchronous>, transform_indices = @transform_4, window_bounds = array<i64: 1, 128>}, {transform_indices = @transform_5, window_bounds = array<i64: 16, 128>}]} {
    %c0 = arith.constant 0 : index
    %c0_0 = arith.constant 0 : index
    %0 = vector.load %arg1[%c0, %c0_0] : memref<16x128xf32, #tpu.memory_space<vmem>>, vector<16x128xf32>
    %c0_1 = arith.constant 0 : index
    %c0_2 = arith.constant 0 : index
    %1 = vector.load %arg2[%c0_1, %c0_2] : memref<128x128xf32, #tpu.memory_space<vmem>>, vector<128x128xf32>
    %cst = arith.constant dense<0.000000e+00> : vector<16x128xf32>
    %2 = tpu.matmul %0, %1, %cst {dimension_numbers = #tpu.dot_dimension_numbers<[1], [0], [0], [1], [0, 0, 1, 1], [], []>} : vector<16x128xf32>, vector<128x128xf32>, vector<16x128xf32> -> vector<16x128xf32>
    %c0_3 = arith.constant 0 : index
    %c0_4 = arith.constant 0 : index
    %3 = vector.load %arg3[%c0_3, %c0_4] : memref<1x128xf32, #tpu.memory_space<vmem>>, vector<1x128xf32>
    %4 = vector.broadcast %3 : vector<1x128xf32> to vector<16x128xf32>
    %5 = arith.addf %2, %4 : vector<16x128xf32>
    %6 = arith.mulf %5, %5 : vector<16x128xf32>
    %cst_5 = arith.constant 0.0356774069 : f32
    %7 = vector.broadcast %cst_5 : f32 to vector<16x128xf32>
    %8 = arith.mulf %7, %6 : vector<16x128xf32>
    %cst_6 = arith.constant 0.797884583 : f32
    %9 = vector.broadcast %cst_6 : f32 to vector<16x128xf32>
    %10 = arith.addf %9, %8 : vector<16x128xf32>
    %11 = arith.mulf %5, %10 : vector<16x128xf32>
    %12 = math.tanh %11 : vector<16x128xf32>
    %cst_7 = arith.constant 5.000000e-01 : f32
    %13 = vector.broadcast %cst_7 : f32 to vector<16x128xf32>
    %14 = arith.mulf %13, %5 : vector<16x128xf32>
    %cst_8 = arith.constant 1.000000e+00 : f32
    %15 = vector.broadcast %cst_8 : f32 to vector<16x128xf32>
    %16 = arith.addf %15, %12 : vector<16x128xf32>
    %17 = arith.mulf %14, %16 : vector<16x128xf32>
    %c0_9 = arith.constant 0 : index
    %c0_10 = arith.constant 0 : index
    %18 = vector.load %arg4[%c0_9, %c0_10] : memref<128x128xf32, #tpu.memory_space<vmem>>, vector<128x128xf32>
    %cst_11 = arith.constant dense<0.000000e+00> : vector<16x128xf32>
    %19 = tpu.matmul %17, %18, %cst_11 {dimension_numbers = #tpu.dot_dimension_numbers<[1], [0], [0], [1], [0, 0, 1, 1], [], []>} : vector<16x128xf32>, vector<128x128xf32>, vector<16x128xf32> -> vector<16x128xf32>
    %c0_12 = arith.constant 0 : index
    %c0_13 = arith.constant 0 : index
    %20 = vector.load %arg5[%c0_12, %c0_13] : memref<1x128xf32, #tpu.memory_space<vmem>>, vector<1x128xf32>
    %21 = vector.broadcast %20 : vector<1x128xf32> to vector<16x128xf32>
    %22 = arith.addf %19, %21 : vector<16x128xf32>
    %c0_14 = arith.constant 0 : index
    %c0_15 = arith.constant 0 : index
    %23 = vector.load %arg6[%c0_14, %c0_15] : memref<16x128xf32, #tpu.memory_space<vmem>>, vector<16x128xf32>
    tpu.vector_store %arg6[%c0_14, %c0_15], %22 {strides = array<i32>} : memref<16x128xf32, #tpu.memory_space<vmem>>, vector<16x128xf32>,
    return
  }
  func.func @transform_0(%arg0: i32) -> (i32, i32) {
    %c0_i32 = arith.constant 0 : i32
    %c0_i32_0 = arith.constant 0 : i32
    return %arg0, %c0_i32 : i32, i32
  }
  func.func @transform_1(%arg0: i32) -> (i32, i32) {
    %c0_i32 = arith.constant 0 : i32
    %c0_i32_0 = arith.constant 0 : i32
    %c0_i32_1 = arith.constant 0 : i32
    return %c0_i32, %c0_i32_0 : i32, i32
  }
  func.func @transform_2(%arg0: i32) -> (i32, i32) {
    %c0_i32 = arith.constant 0 : i32
    %c0_i32_0 = arith.constant 0 : i32
    %c0_i32_1 = arith.constant 0 : i32
    return %c0_i32, %c0_i32_0 : i32, i32
  }
  func.func @transform_3(%arg0: i32) -> (i32, i32) {
    %c0_i32 = arith.constant 0 : i32
    %c0_i32_0 = arith.constant 0 : i32
    %c0_i32_1 = arith.constant 0 : i32
    return %c0_i32, %c0_i32_0 : i32, i32
  }
  func.func @transform_4(%arg0: i32) -> (i32, i32) {
    %c0_i32 = arith.constant 0 : i32
    %c0_i32_0 = arith.constant 0 : i32
    %c0_i32_1 = arith.constant 0 : i32
    return %c0_i32, %c0_i32_0 : i32, i32
  }
  func.func @transform_5(%arg0: i32) -> (i32, i32) {
    %c0_i32 = arith.constant 0 : i32
    %c0_i32_0 = arith.constant 0 : i32
    return %arg0, %c0_i32 : i32, i32
  }
}

</mosaic_0001>

<bundles_post_ra>
// kernel: tpu_custom_call.1
= control target key start
LH: loop header
LB: loop body
LE: loop exit
PB: predicated region body
PF: predicated region fallthrough
CT: control target
= control target key end

     0   :  { %10 = vsyncpa [#allocation3], 0  ;;  %s566_s0 = inlined_call_operand.hbm [shape: f32[16,128], index: 0, kind: input, shape index: {}]   ;;  %s567_s1 = inlined_call_operand.hbm [shape: f32[128,128], index: 1, kind: input, shape index: {}]   ;;  %s568_s2 = inlined_call_operand.vmem [shape: f32[1,128], index: 2, kind: input, shape index: {}]   ;;  %s569_s3 = inlined_call_operand.hbm [shape: f32[128,128], index: 3, kind: input, shape index: {}]   ;;  %s570_s4 = inlined_call_operand.vmem [shape: f32[1,128], index: 4, kind: input, shape index: {}]   ;;  %s571_s5 = inlined_call_operand.hbm [shape: f32[16,128], index: 5, kind: output, shape index: {}]  }
   0x1   :  { %11 = vsyncpa [#allocation6], 0 }
   0x2   :  { %12 = vsyncpa [#allocation4], 0  ;;  %s500_s18 = smov [#allocation5]   ;;  %s501_s20 = smov [#allocation2]  }
   0x3   :  { %s30_s19 = sshll.u32 %s500_s18, 4  ;;  %s18_s21 = sshll.u32 %s501_s20, 4  ;;  %s31_s19 = int_to_ptr.vmem [resolvable:$true] %s30_s19  ;;  %s19_s21 = int_to_ptr.vmem [resolvable:$true] %s18_s21 }
   0x4   :  { %s422_s22 = scalar_lea.vmem %s31_s19, 2048  ;;  %p427_p1 = scmp.lt.s32.totalorder %s31_s19, %s31_s19 }
   0x5   :  { %p423_p0 = scmp.ne.s32.totalorder %s31_s19, %s422_s22  ;;  %p428_p2 = scmp.lt.s32.totalorder %s422_s22, %s422_s22 }
   0x7   :  { %p429_p3 = por %p428_p2, %p427_p1 }
   0x9   :  { %p430_p4 = pnand %p429_p3, %p423_p0 }
   0xb   :  { %433 = shalt.err (!%p430_p4)
}
   0xc   :  { %s502_s23 = smov 128   ;;  %s503_s24 = smov 8  }
   0xd   :  { %36 = dma.hbm_to_vmem [thread:$0]  %s567_s1, 2048, %s31_s19, [#allocation6], %s502_s23, %s502_s23, %s503_s24  }
   0xe   :  { %s442_s27 = scalar_lea.vmem %s19_s21, 256  ;;  %p447_p6 = scmp.lt.s32.totalorder %s19_s21, %s19_s21 }
   0xf   :  { %p443_p5 = scmp.ne.s32.totalorder %s19_s21, %s442_s27  ;;  %p448_p7 = scmp.lt.s32.totalorder %s442_s27, %s442_s27 }
  0x11   :  { %p449_p8 = por %p448_p7, %p447_p6 }
  0x13   :  { %p450_p9 = pnand %p449_p8, %p443_p5 }
  0x15   :  { %453 = shalt.err (!%p450_p9)
}
  0x16   :  { %24 = dma.hbm_to_vmem [thread:$0]  %s566_s0, 256, %s19_s21, [#allocation3], %s502_s23, %s502_s23, %s503_s24  }
  0x17   :  { %s504_s30 = smov [#allocation7]  }
  0x18   :  { %s44_s6 = sshll.u32 %s504_s30, 4  ;;  %s45_s6 = int_to_ptr.vmem [resolvable:$true] %s44_s6 }
  0x19   :  { %s462_s7 = scalar_lea.vmem %s45_s6, 2048  ;;  %p467_p11 = scmp.lt.s32.totalorder %s45_s6, %s45_s6 }
  0x1a   :  { %p463_p10 = scmp.ne.s32.totalorder %s45_s6, %s462_s7  ;;  %p468_p12 = scmp.lt.s32.totalorder %s462_s7, %s462_s7 }
  0x1c   :  { %p469_p13 = por %p468_p12, %p467_p11 }
  0x1e   :  { %p470_p0 = pnand %p469_p13, %p463_p10 }
  0x20   :  { %473 = shalt.err (!%p470_p0)
}
  0x21   :  { %50 = dma.hbm_to_vmem [thread:$0]  %s569_s3, 2048, %s45_s6, [#allocation6], %s502_s23, %s502_s23, %s503_s24  }
  0x22   :  { %494 = dma.done.wait [#allocation3], 256  }
  0x23   :  { %495 = vsyncadd [#allocation3], 4294967040 }
  0x24   :  { %496 = dma.done.wait [#allocation6], 4096  }
  0x25   :  { %497 = vsyncadd [#allocation6], 4294963200  ;;  %v79_v0 = vld [vmem:[#allocation5 + $0x78] sm:$0xff]  ;;  %v78_v1 = vld [vmem:[#allocation5 + $0x70] sm:$0xff]  ;;  %s505_s10 = smov [#allocation8]  }
  0x26   :  { %334 = vmatprep.subr.mxu0 %v79_v0  ;;  %v77_v2 = vld [vmem:[#allocation5 + $0x68] sm:$0xff]  ;;  %v76_v3 = vld [vmem:[#allocation5 + $0x60] sm:$0xff]  ;;  %v62_v4 = vld [vmem:[#allocation2] sm:$0xff]  ;;  %s283_s11 = sshll.u32 %s505_s10, 4  ;;  %s284_s11 = int_to_ptr.vmem [resolvable:$true] %s283_s11 }
  0x27   :  { %335 = vmatpush3.msra.mxu0 %v79_v0  ;;  %v75_v5 = vld [vmem:[#allocation5 + $0x58] sm:$0xff]  ;;  %366 = vmatprep.mubr.f32.mxu0 %v62_v4  ;;  %v74_v6 = vld [vmem:[#allocation5 + $0x50] sm:$0xff]  ;;  %v73_v7 = vld [vmem:[#allocation5 + $0x48] sm:$0xff]  ;;  %s474_s12 = scalar_lea.vmem %s284_s11, 256  ;;  %p479_p2 = scmp.lt.s32.totalorder %s284_s11, %s284_s11 }
  0x28   :  { %336 = vmatprep.subr.mxu0 %v78_v1  ;;  %v72_v8 = vld [vmem:[#allocation5 + $0x40] sm:$0xff]  ;;  %v71_v9 = vld [vmem:[#allocation5 + $0x38] sm:$0xff]  ;;  %v70_v10 = vld [vmem:[#allocation5 + $0x30] sm:$0xff]  ;;  %p475_p1 = scmp.ne.s32.totalorder %s284_s11, %s474_s12  ;;  %p480_p3 = scmp.lt.s32.totalorder %s474_s12, %s474_s12 }
  0x29   :  { %337 = vmatpush3.msra.mxu0 %v78_v1  ;;  %v69_v11 = vld [vmem:[#allocation5 + $0x28] sm:$0xff]  ;;  %v68_v12 = vld [vmem:[#allocation5 + $0x20] sm:$0xff]  ;;  %v67_v13 = vld [vmem:[#allocation5 + $0x18] sm:$0xff] }
  0x2a   :  { %338 = vmatprep.subr.mxu0 %v77_v2  ;;  %v66_v14 = vld [vmem:[#allocation5 + $0x10] sm:$0xff]  ;;  %v65_v15 = vld [vmem:[#allocation5 + $0x8] sm:$0xff]  ;;  %v64_v16 = vld [vmem:[#allocation5] sm:$0xff]  ;;  %p481_p4 = por %p480_p3, %p479_p2 }
  0x2b   :  { %339 = vmatpush3.msra.mxu0 %v77_v2  ;;  %v63_v17 = vld [vmem:[#allocation2 + $0x8] sm:$0xff]  ;;  %v192_v19 = vld [vmem:[#allocation7 + $0x70] sm:$0xff]  ;;  %v191_v20 = vld [vmem:[#allocation7 + $0x68] sm:$0xff] }
  0x2c   :  { %340 = vmatprep.subr.mxu0 %v76_v3  ;;  %v193_v18 = vld [vmem:[#allocation7 + $0x78] sm:$0xff]  ;;  %v190_v21 = vld [vmem:[#allocation7 + $0x60] sm:$0xff]  ;;  %v188_v23 = vld [vmem:[#allocation7 + $0x50] sm:$0xff]  ;;  %p482_p5 = pnand %p481_p4, %p475_p1 }
  0x2d   :  { %341 = vmatpush3.msra.mxu0 %v76_v3  ;;  %369 = vmatprep.subr.mxu1 %v193_v18  ;;  %v189_v22 = vld [vmem:[#allocation7 + $0x58] sm:$0xff]  ;;  %v187_v24 = vld [vmem:[#allocation7 + $0x48] sm:$0xff]  ;;  %v186_v25 = vld [vmem:[#allocation7 + $0x40] sm:$0xff] }
  0x2e   :  { %342 = vmatprep.subr.mxu0 %v75_v5  ;;  %370 = vmatpush3.msra.mxu1 %v193_v18  ;;  %v185_v26 = vld [vmem:[#allocation7 + $0x38] sm:$0xff]  ;;  %v184_v27 = vld [vmem:[#allocation7 + $0x30] sm:$0xff]  ;;  %v183_v28 = vld [vmem:[#allocation7 + $0x28] sm:$0xff] }
  0x2f   :  { %343 = vmatpush3.msra.mxu0 %v75_v5  ;;  %371 = vmatprep.subr.mxu1 %v192_v19  ;;  %v182_v29 = vld [vmem:[#allocation7 + $0x20] sm:$0xff]  ;;  %v181_v30 = vld [vmem:[#allocation7 + $0x18] sm:$0xff]  ;;  %v180_v31 = vld [vmem:[#allocation7 + $0x10] sm:$0xff] }
  0x30   :  { %344 = vmatprep.subr.mxu0 %v74_v6  ;;  %372 = vmatpush3.msra.mxu1 %v192_v19  ;;  %v179_v32 = vld [vmem:[#allocation7 + $0x8] sm:$0xff]  ;;  %v178_v33 = vld [vmem:[#allocation7] sm:$0xff]  ;;  %v296_v34 = vld [vmem:[%s568_s2] ss:$0 sm:$0xff] }
  0x31   :  { %345 = vmatpush3.msra.mxu0 %v74_v6  ;;  %373 = vmatprep.subr.mxu1 %v191_v20  ;;  %v297_v55 = vld [vmem:[%s570_s4] ss:$0 sm:$0xff] }
  0x32   :  { %346 = vmatprep.subr.mxu0 %v73_v7  ;;  %374 = vmatpush3.msra.mxu1 %v191_v20 }
  0x33   :  { %347 = vmatpush3.msra.mxu0 %v73_v7  ;;  %375 = vmatprep.subr.mxu1 %v190_v21 }
  0x34   :  { %348 = vmatprep.subr.mxu0 %v72_v8  ;;  %376 = vmatpush3.msra.mxu1 %v190_v21 }
  0x35   :  { %349 = vmatpush3.msra.mxu0 %v72_v8  ;;  %377 = vmatprep.subr.mxu1 %v189_v22 }
  0x36   :  { %350 = vmatprep.subr.mxu0 %v71_v9  ;;  %378 = vmatpush3.msra.mxu1 %v189_v22 }
  0x37   :  { %351 = vmatpush3.msra.mxu0 %v71_v9  ;;  %379 = vmatprep.subr.mxu1 %v188_v23 }
  0x38   :  { %352 = vmatprep.subr.mxu0 %v70_v10  ;;  %380 = vmatpush3.msra.mxu1 %v188_v23 }
  0x39   :  { %353 = vmatpush3.msra.mxu0 %v70_v10  ;;  %381 = vmatprep.subr.mxu1 %v187_v24 }
  0x3a   :  { %354 = vmatprep.subr.mxu0 %v69_v11  ;;  %382 = vmatpush3.msra.mxu1 %v187_v24 }
  0x3b   :  { %355 = vmatpush3.msra.mxu0 %v69_v11  ;;  %383 = vmatprep.subr.mxu1 %v186_v25 }
  0x3c   :  { %356 = vmatprep.subr.mxu0 %v68_v12  ;;  %384 = vmatpush3.msra.mxu1 %v186_v25 }
  0x3d   :  { %357 = vmatpush3.msra.mxu0 %v68_v12  ;;  %385 = vmatprep.subr.mxu1 %v185_v26 }
  0x3e   :  { %358 = vmatprep.subr.mxu0 %v67_v13  ;;  %386 = vmatpush3.msra.mxu1 %v185_v26 }
  0x3f   :  { %359 = vmatpush3.msra.mxu0 %v67_v13  ;;  %387 = vmatprep.subr.mxu1 %v184_v27 }
  0x40   :  { %360 = vmatprep.subr.mxu0 %v66_v14  ;;  %388 = vmatpush3.msra.mxu1 %v184_v27 }
  0x41   :  { %361 = vmatpush3.msra.mxu0 %v66_v14  ;;  %389 = vmatprep.subr.mxu1 %v183_v28 }
  0x42   :  { %362 = vmatprep.subr.mxu0 %v65_v15  ;;  %390 = vmatpush3.msra.mxu1 %v183_v28 }
  0x43   :  { %363 = vmatpush3.msra.mxu0 %v65_v15  ;;  %391 = vmatprep.subr.mxu1 %v182_v29 }
  0x44   :  { %364 = vmatprep.subr.mxu0 %v64_v16  ;;  %392 = vmatpush3.msra.mxu1 %v182_v29 }
  0x45   :  { %365 = vmatpush3.msra.mxu0 %v64_v16  ;;  %393 = vmatprep.subr.mxu1 %v181_v30 }
  0x46   :  { %367 = vmatmul.mubr.f32.vlgmr.msra.gmra.mxu0 %v63_v17  ;;  %394 = vmatpush3.msra.mxu1 %v181_v30 }
  0x47   :  { %395 = vmatprep.subr.mxu1 %v180_v31 }
  0x48   :  { %396 = vmatpush3.msra.mxu1 %v180_v31 }
  0x49   :  { %397 = vmatprep.subr.mxu1 %v179_v32 }
  0x4a   :  { %398 = vmatpush3.msra.mxu1 %v179_v32 }
  0x4b   :  { %399 = vmatprep.subr.mxu1 %v178_v33 }
  0x4c   :  { %400 = vmatpush3.msra.mxu1 %v178_v33 }
 0x106   :  { %v368_v35 = vpop.f32.mrf.mxu0 }
 0x107   :  { %v159_v36 = vadd.f32 %v368_v35, %v296_v34 }
 0x108   :  { %v153_v37 = vpop.f32.mrf.mxu0 }
 0x109   :  { %v163_v38 = vmul.f32 %v159_v36, %v159_v36  ;;  %v154_v39 = vadd.f32 %v296_v34, %v153_v37  ;;  %v173_v52 = vmul.f32 0.5, %v159_v36 }
 0x10b   :  { %v165_v40 = vmul.f32 0.035677407, %v163_v38  ;;  %v162_v41 = vmul.f32 %v154_v39, %v154_v39  ;;  %v172_v50 = vmul.f32 0.5, %v154_v39 }
 0x10d   :  { %v167_v42 = vadd.f32 0.7978846, %v165_v40  ;;  %v164_v43 = vmul.f32 0.035677407, %v162_v41 }
 0x10f   :  { %v169_v44 = vmul.f32 %v167_v42, %v159_v36  ;;  %v166_v45 = vadd.f32 0.7978846, %v164_v43 }
 0x111   :  { %410 = vtanh.f32 %v169_v44  ;;  %v168_v46 = vmul.f32 %v166_v45, %v154_v39 }
 0x113   :  { %412 = vtanh.f32 %v168_v46 }
 0x11e   :  { %v411_v47 = vpop.eup %410 }
 0x11f   :  { %v175_v49 = vadd.f32 1.0, %v411_v47 }
 0x120   :  { %v413_v48 = vpop.eup %412 }
 0x121   :  { %v174_v51 = vadd.f32 1.0, %v413_v48  ;;  %v177_v54 = vmul.f32 %v175_v49, %v173_v52 }
 0x123   :  { %v176_v53 = vmul.f32 %v174_v51, %v172_v50 }
 0x125   :  { %401 = vmatprep.mubr.f32.mxu1 %v176_v53 }
 0x126   :  { %402 = vmatmul.mubr.f32.vlgmr.msra.gmra.mxu1 %v177_v54 }
 0x1e6   :  { %v403_v56 = vpop.f32.mrf.mxu1 }
 0x1e7   :  { %v273_v57 = vadd.f32 %v403_v56, %v297_v55 }
 0x1e8   :  { %v267_v58 = vpop.f32.mrf.mxu1 }
 0x1e9   :  { %277 = vst [vmem:[#allocation8 + $0x8] sm:$0xff] %v273_v57  ;;  %v268_v59 = vadd.f32 %v297_v55, %v267_v58 }
 0x1eb   :  { %276 = vst [vmem:[#allocation8] sm:$0xff] %v268_v59 }
 0x1ec   :  { %485 = shalt.err (!%p482_p5)
}
 0x1ed   :  { %289 = dma.vmem_to_hbm [thread:$0]  %s284_s11, 256, %s571_s5, [#allocation4], %s502_s23, %s502_s23, %s503_s24  }
 0x1ee   :  { %498 = dma.done.wait [#allocation4], 256  }
 0x1ef   :  { %499 = vsyncadd [#allocation4], 4294967040 }
 0x1f0   :  { %293 = vsyncpa [#allocation3], 1 }
 0x1f1   :  { %294 = vsyncpa [#allocation6], 1 }
 0x1f2   :  { %295 = vsyncpa [#allocation4], 1 }

</bundles_post_ra>
